<compile_context>
chip_gen: v7x
topology: tpu7x:2x2x1
jax: 0.10.0
libtpu: 0.0.40
codegen_flags: <defaults>
</compile_context>

<pallas_src>
import math

import jax
import jax.numpy as jnp
from jax.experimental import pallas as pl
from jax.experimental.pallas import tpu as pltpu


_NEG_BIG = -1e30  # bias padding for fake vocab columns.


def _round_up(x, m):
    return ((x + m - 1) // m) * m


# ----------------------------------------------------------------------------
# Single-pass kernel: whole (padded) vocab is one tile.
# ----------------------------------------------------------------------------
def _generator_kernel_single(x_ref, w_ref, b_ref, o_ref):
    # x_ref: (tm, H) bf16   w_ref: (H, v_pad) bf16   b_ref: (1, v_pad) f32
    score = jnp.dot(x_ref[...], w_ref[...], preferred_element_type=jnp.float32)
    score = score + b_ref[...]
    m = jnp.max(score, axis=-1, keepdims=True)
    lse = m + jnp.log(jnp.sum(jnp.exp(score - m), axis=-1, keepdims=True))
    o_ref[...] = (score - lse).astype(o_ref.dtype)


# ----------------------------------------------------------------------------
# Two-pass (flash log-softmax) kernel: vocab is tiled.
# ----------------------------------------------------------------------------
def _generator_kernel_tiled(x_ref, w_ref, b_ref, o_ref, m_scr, l_scr):
    # x_ref: (tm, H) bf16   w_ref: (H, tv) bf16   b_ref: (1, tv) f32
    # o_ref: (tm, tv)       m_scr/l_scr: (tm, 1) f32 running max / sum-exp
    p = pl.program_id(1)  # 0: statistics pass, 1: write pass
    j = pl.program_id(2)  # vocab tile index

    # bf16 operands, f32 MXU accumulation; bias add + softmax math in f32.
    score = jnp.dot(x_ref[...], w_ref[...], preferred_element_type=jnp.float32)
    score = score + b_ref[...]

    @pl.when(jnp.logical_and(p == 0, j == 0))
    def _init():
        m_scr[...] = jnp.full_like(m_scr, -jnp.inf)
        l_scr[...] = jnp.zeros_like(l_scr)

    @pl.when(p == 0)
    def _stats():  # online running max / sum-exp over vocab tiles
        m_prev = m_scr[...]
        m_new = jnp.maximum(m_prev, jnp.max(score, axis=-1, keepdims=True))
        l_scr[...] = l_scr[...] * jnp.exp(m_prev - m_new) + jnp.sum(
            jnp.exp(score - m_new), axis=-1, keepdims=True)
        m_scr[...] = m_new

    @pl.when(p == 1)
    def _write():
        lse = m_scr[...] + jnp.log(l_scr[...])
        o_ref[...] = (score - lse).astype(o_ref.dtype)


def generator_forward(dec_out, weight, bias, *, tm=256, tv=2048,
                      compute_dtype=jnp.bfloat16):
    """log_softmax(dec_out @ weight.T + bias, axis=-1).

    dec_out: (B, S, H); weight: (V, H) (nn.Linear layout); bias: (V,).
    Returns (B, S, V) in dec_out.dtype.
    """
    B, S, H = dec_out.shape
    V = weight.shape[0]
    N = B * S

    # Tile sizing: clamp to the (rounded-up) problem size, pad the rest.
    tm = min(tm, _round_up(N, 8))        # sublane multiple
    tv = min(tv, _round_up(V, 128))      # lane multiple
    n_pad = _round_up(N, tm)
    v_pad = _round_up(V, tv)

    x = dec_out.reshape(N, H).astype(compute_dtype)
    if n_pad != N:
        x = jnp.pad(x, ((0, n_pad - N), (0, 0)))

    w_t = weight.T.astype(compute_dtype)  # (H, V), lane-dense on vocab
    if v_pad != V:
        w_t = jnp.pad(w_t, ((0, 0), (0, v_pad - V)))

    b2 = bias.astype(jnp.float32).reshape(1, V)
    if v_pad != V:
        b2 = jnp.pad(b2, ((0, 0), (0, v_pad - V)), constant_values=_NEG_BIG)

    single_pass = v_pad <= tv

    if single_pass:
        # One vocab tile: compute + reduce + write in a single grid step.
        grid = (n_pad // tm,)
        out = pl.pallas_call(
            _generator_kernel_single,
            out_shape=jax.ShapeDtypeStruct((n_pad, v_pad), dec_out.dtype),
            grid_spec=pltpu.PrefetchScalarGridSpec(
                num_scalar_prefetch=0,
                grid=grid,
                in_specs=[
                    pl.BlockSpec((tm, H), lambda i: (i, 0)),        # row tile
                    pl.BlockSpec((H, v_pad), lambda i: (0, 0)),     # weight (resident)
                    pl.BlockSpec((1, v_pad), lambda i: (0, 0)),     # bias (resident)
                ],
                out_specs=pl.BlockSpec((tm, v_pad), lambda i: (i, 0)),
            ),
            compiler_params=pltpu.CompilerParams(
                dimension_semantics=("parallel",),
                vmem_limit_bytes=32 * 1024 * 1024,
            ),
        )(x, w_t, b2)
    else:
        grid = (n_pad // tm, 2, v_pad // tv)
        out = pl.pallas_call(
            _generator_kernel_tiled,
            out_shape=jax.ShapeDtypeStruct((n_pad, v_pad), dec_out.dtype),
            grid_spec=pltpu.PrefetchScalarGridSpec(
                num_scalar_prefetch=0,
                grid=grid,
                in_specs=[
                    pl.BlockSpec((tm, H), lambda i, p, j: (i, 0)),   # row tile (resident)
                    pl.BlockSpec((H, tv), lambda i, p, j: (0, j)),   # weight tile
                    pl.BlockSpec((1, tv), lambda i, p, j: (0, j)),   # bias tile
                ],
                # Pass 0 parks the output window on vocab tile 0 (no writes,
                # no garbage flush); pass 1 walks the vocab tiles and writes.
                out_specs=pl.BlockSpec((tm, tv), lambda i, p, j: (i, j * p)),
                scratch_shapes=[
                    pltpu.VMEM((tm, 1), jnp.float32),   # running max
                    pltpu.VMEM((tm, 1), jnp.float32),   # running sum-exp
                ],
            ),
            compiler_params=pltpu.CompilerParams(
                dimension_semantics=("parallel", "arbitrary", "arbitrary"),
                vmem_limit_bytes=32 * 1024 * 1024,
            ),
        )(x, w_t, b2)

    return out[:N, :V].reshape(B, S, V)


def init_generator_params(key, hidden_size, vocab_size):
    """Deterministic synthetic init matching nn.Linear + xavier_uniform_ weight."""
    kw, kb = jax.random.split(key)
    bound_w = math.sqrt(6.0 / (hidden_size + vocab_size))
    weight = jax.random.uniform(
        kw, (vocab_size, hidden_size), jnp.float32, -bound_w, bound_w)
    bound_b = 1.0 / math.sqrt(hidden_size)
    bias = jax.random.uniform(kb, (vocab_size,), jnp.float32, -bound_b, bound_b)
    return weight, bias


def _reference(dec_out, weight, bias):
    # Reference uses the same bf16 operands / f32 accumulation as the kernel.
    B, S, H = dec_out.shape
    V = weight.shape[0]
    x_bf = dec_out.reshape(B * S, H).astype(jnp.bfloat16)
    w_bf = weight.T.astype(jnp.bfloat16)
    score = jnp.dot(x_bf, w_bf, preferred_element_type=jnp.float32) + bias
    return jax.nn.log_softmax(score, axis=-1).reshape(B, S, V)


if __name__ == "__main__":
    key = jax.random.PRNGKey(0)
    k_x, k_p = jax.random.split(key)

    # --- Case 1: single-pass path, with row padding (N=14) and vocab padding.
    B, S, H, V = 2, 7, 32, 130
    dec_out = jax.random.normal(k_x, (B, S, H), dtype=jnp.float32)
    weight, bias = init_generator_params(k_p, H, V)

    lsm_score = generator_forward(dec_out, weight, bias)
    jax.block_until_ready(lsm_score)

    ref = _reference(dec_out, weight, bias)
    assert lsm_score.shape == (B, S, V)
    assert jnp.allclose(lsm_score, ref.astype(lsm_score.dtype),
                        atol=1e-3, rtol=1e-3), \
        float(jnp.max(jnp.abs(lsm_score - ref)))

    # --- Case 2: two-pass (flash log-softmax) path across vocab tiles.
    B2, S2, H2, V2 = 2, 8, 32, 385
    dec_out2 = jax.random.normal(k_x, (B2, S2, H2), dtype=jnp.float32)
    weight2, bias2 = init_generator_params(k_p, H2, V2)

    lsm_score2 = generator_forward(dec_out2, weight2, bias2, tm=64, tv=128)
    jax.block_until_ready(lsm_score2)

    ref2 = _reference(dec_out2, weight2, bias2)
    assert lsm_score2.shape == (B2, S2, V2)
    assert jnp.allclose(lsm_score2, ref2.astype(lsm_score2.dtype),
                        atol=1e-3, rtol=1e-3), \
        float(jnp.max(jnp.abs(lsm_score2 - ref2)))

    print("KERNEL_OK")
</pallas_src>

<mosaic_0001>
module attributes {stable_mosaic.version = 11 : i64} {
  func.func @_generator_kernel_single(%arg0: i32, %arg1: memref<16x32xbf16, #tpu.memory_space<vmem>>, %arg2: memref<32x256xbf16, #tpu.memory_space<vmem>>, %arg3: memref<1x256xf32, #tpu.memory_space<vmem>>, %arg4: memref<16x256xf32, #tpu.memory_space<vmem>>) attributes {dimension_semantics = [#tpu.dimension_semantics<parallel>], iteration_bounds = array<i64: 1>, scalar_prefetch = 0 : i64, scratch_operands = 0 : i64, tpu.core_type = #tpu.core_type<tc>, window_params = [{transform_indices = @transform_0, window_bounds = array<i64: 16, 32>}, {pipeline_mode = #tpu.pipeline_mode<synchronous>, transform_indices = @transform_1, window_bounds = array<i64: 32, 256>}, {pipeline_mode = #tpu.pipeline_mode<synchronous>, transform_indices = @transform_2, window_bounds = array<i64: 1, 256>}, {transform_indices = @transform_3, window_bounds = array<i64: 16, 256>}]} {
    %c0 = arith.constant 0 : index
    %c0_0 = arith.constant 0 : index
    %0 = vector.load %arg1[%c0, %c0_0] : memref<16x32xbf16, #tpu.memory_space<vmem>>, vector<16x32xbf16>
    %c0_1 = arith.constant 0 : index
    %c0_2 = arith.constant 0 : index
    %1 = vector.load %arg2[%c0_1, %c0_2] : memref<32x256xbf16, #tpu.memory_space<vmem>>, vector<32x256xbf16>
    %cst = arith.constant dense<0.000000e+00> : vector<16x256xf32>
    %2 = tpu.matmul %0, %1, %cst {dimension_numbers = #tpu.dot_dimension_numbers<[1], [0], [0], [1], [0, 0, 1, 1], [], []>} : vector<16x32xbf16>, vector<32x256xbf16>, vector<16x256xf32> -> vector<16x256xf32>
    %c0_3 = arith.constant 0 : index
    %c0_4 = arith.constant 0 : index
    %3 = vector.load %arg3[%c0_3, %c0_4] : memref<1x256xf32, #tpu.memory_space<vmem>>, vector<1x256xf32>
    %4 = vector.broadcast %3 : vector<1x256xf32> to vector<16x256xf32>
    %5 = arith.addf %2, %4 : vector<16x256xf32>
    %cst_5 = arith.constant dense<0xFF800000> : vector<16xf32>
    %6 = vector.multi_reduction <maximumf>, %5, %cst_5 [1] : vector<16x256xf32> to vector<16xf32>
    %7 = vector.shape_cast %6 : vector<16xf32> to vector<16x1xf32>
    %8 = vector.broadcast %7 : vector<16x1xf32> to vector<16x256xf32>
    %9 = arith.subf %5, %8 : vector<16x256xf32>
    %10 = math.exp %9 : vector<16x256xf32>
    %cst_6 = arith.constant dense<0.000000e+00> : vector<16xf32>
    %11 = vector.multi_reduction <add>, %10, %cst_6 [1] : vector<16x256xf32> to vector<16xf32>
    %12 = vector.shape_cast %11 : vector<16xf32> to vector<16x1xf32>
    %13 = math.log %12 : vector<16x1xf32>
    %14 = arith.addf %7, %13 : vector<16x1xf32>
    %15 = vector.broadcast %14 : vector<16x1xf32> to vector<16x256xf32>
    %16 = arith.subf %5, %15 : vector<16x256xf32>
    %c0_7 = arith.constant 0 : index
    %c0_8 = arith.constant 0 : index
    %17 = vector.load %arg4[%c0_7, %c0_8] : memref<16x256xf32, #tpu.memory_space<vmem>>, vector<16x256xf32>
    tpu.vector_store %arg4[%c0_7, %c0_8], %16 {strides = array<i32>} : memref<16x256xf32, #tpu.memory_space<vmem>>, vector<16x256xf32>,
    return
  }
  func.func @transform_0(%arg0: i32) -> (i32, i32) {
    %c0_i32 = arith.constant 0 : i32
    %c0_i32_0 = arith.constant 0 : i32
    return %arg0, %c0_i32 : i32, i32
  }
  func.func @transform_1(%arg0: i32) -> (i32, i32) {
    %c0_i32 = arith.constant 0 : i32
    %c0_i32_0 = arith.constant 0 : i32
    %c0_i32_1 = arith.constant 0 : i32
    return %c0_i32, %c0_i32_0 : i32, i32
  }
  func.func @transform_2(%arg0: i32) -> (i32, i32) {
    %c0_i32 = arith.constant 0 : i32
    %c0_i32_0 = arith.constant 0 : i32
    %c0_i32_1 = arith.constant 0 : i32
    return %c0_i32, %c0_i32_0 : i32, i32
  }
  func.func @transform_3(%arg0: i32) -> (i32, i32) {
    %c0_i32 = arith.constant 0 : i32
    %c0_i32_0 = arith.constant 0 : i32
    return %arg0, %c0_i32 : i32, i32
  }
}

</mosaic_0001>

<bundles_post_ra>
// kernel: tpu_custom_call.1
= control target key start
LH: loop header
LB: loop body
LE: loop exit
PB: predicated region body
PF: predicated region fallthrough
CT: control target
= control target key end

     0   :  { %8 = vsyncpa [#allocation3], 0  ;;  %s366_s0 = inlined_call_operand.hbm [shape: bf16[16,32], index: 0, kind: input, shape index: {}]   ;;  %s367_s1 = inlined_call_operand.hbm [shape: bf16[32,256], index: 1, kind: input, shape index: {}]   ;;  %s368_s2 = inlined_call_operand.vmem [shape: f32[1,256], index: 2, kind: input, shape index: {}]   ;;  %s369_s3 = inlined_call_operand.hbm [shape: f32[16,256], index: 3, kind: output, shape index: {}]  }
   0x1   :  { %9 = vsyncpa [#allocation6], 0 }
   0x2   :  { %10 = vsyncpa [#allocation4], 0  ;;  %s297_s12 = smov [#allocation2]   ;;  %s225_s16 = scalar_lea.hbm %s366_s0, 128 }
   0x3   :  { %s16_s13 = sshll.u32 %s297_s12, 4  ;;  %p226_p0 = scmp.ne.s32.totalorder %s366_s0, %s225_s16  ;;  %s17_s13 = int_to_ptr.vmem [resolvable:$true] %s16_s13 }
   0x4   :  { %p229_p1 = scmp.lt.u32.totalorder %s225_s16, %s366_s0 }
   0x6   :  { %p231_p2 = pnand %p229_p1, %p226_p0 }
   0x8   :  { %234 = shalt.err (!%p231_p2)
}
   0x9   :  { %s235_s21 = scalar_lea.vmem %s17_s13, 128  ;;  %p240_p4 = scmp.lt.s32.totalorder %s17_s13, %s17_s13 }
   0xa   :  { %p236_p3 = scmp.ne.s32.totalorder %s17_s13, %s235_s21  ;;  %p241_p5 = scmp.lt.s32.totalorder %s235_s21, %s235_s21 }
   0xc   :  { %p242_p6 = por %p241_p5, %p240_p4 }
   0xe   :  { %p243_p7 = pnand %p242_p6, %p236_p3 }
  0x10   :  { %246 = shalt.err (!%p243_p7)
}
  0x11   :  { %s298_s22 = smov 64   ;;  %s299_s23 = smov 4  }
  0x12   :  { %22 = dma.hbm_to_vmem [thread:$0]  %s366_s0, 128, %s17_s13, [#allocation3], %s298_s22, %s298_s22, %s299_s23  }
  0x13   :  { %s300_s26 = smov [#allocation5]   ;;  %s247_s30 = scalar_lea.hbm %s367_s1, 512 }
  0x14   :  { %s28_s27 = sshll.u32 %s300_s26, 4  ;;  %p248_p8 = scmp.ne.s32.totalorder %s367_s1, %s247_s30  ;;  %s29_s27 = int_to_ptr.vmem [resolvable:$true] %s28_s27 }
  0x15   :  { %p251_p9 = scmp.lt.u32.totalorder %s247_s30, %s367_s1 }
  0x17   :  { %p253_p10 = pnand %p251_p9, %p248_p8 }
  0x19   :  { %256 = shalt.err (!%p253_p10)
}
  0x1a   :  { %s257_s8 = scalar_lea.vmem %s29_s27, 512  ;;  %p262_p12 = scmp.lt.s32.totalorder %s29_s27, %s29_s27 }
  0x1b   :  { %p258_p11 = scmp.ne.s32.totalorder %s29_s27, %s257_s8  ;;  %p263_p13 = scmp.lt.s32.totalorder %s257_s8, %s257_s8 }
  0x1d   :  { %p264_p0 = por %p263_p13, %p262_p12 }
  0x1f   :  { %p265_p1 = pnand %p264_p0, %p258_p11 }
  0x21   :  { %268 = shalt.err (!%p265_p1)
}
  0x22   :  { %s301_s0 = smov 128   ;;  %s302_s9 = smov 8  }
  0x23   :  { %34 = dma.hbm_to_vmem [thread:$0]  %s367_s1, 512, %s29_s27, [#allocation6], %s301_s0, %s301_s0, %s302_s9  }
  0x24   :  { %291 = dma.done.wait [#allocation3], 128  }
  0x25   :  { %292 = vsyncadd [#allocation3], 4294967168 }
  0x26   :  { %293 = dma.done.wait [#allocation6], 512  }
  0x27   :  { %294 = vsyncadd [#allocation6], 4294966784  ;;  %v303_v0 = vmov 0   ;;  %v206_v1 = vld [vmem:[#allocation5 + $0x4] ss:$8 sps:$4 sm:$0xff]   ;;  %v212_v5 = vld [vmem:[#allocation2] sm:$0xff]   ;;  %v52_v6 = vlaneseq }
  0x28   :  { %123 = vmatprep.mubr.bf16.mxu0 %v303_v0  ;;  %v208_v2 = vld [vmem:[#allocation5] ss:$8 sps:$4 sm:$0xff]   ;;  %91 = vmatprep.subr.bf16.mxu0 %v206_v1  ;;  %v209_v3 = vld [vmem:[#allocation5 + $0x14] ss:$8 sps:$4 sm:$0xff]   ;;  %v211_v4 = vld [vmem:[#allocation5 + $0x10] ss:$8 sps:$4 sm:$0xff]  }
  0x29   :  { %92 = vmatpush1.bf16.msra.mxu0 %v208_v2  ;;  %vm87_vm0 = vcmask 261120   ;;  %v53_v7 = vshrl.u32 %v52_v6, 7  ;;  %v50_v9 = vld [vmem:[%s368_s2] sm:$0x3]  ;;  %s304_s2 = smov [#allocation7]  }
  0x2a   :  { %93 = vmatprep.subr.bf16.mxu0 %v209_v3  ;;  %s177_s13 = sshll.u32 %s304_s2, 4  ;;  %s178_s13 = int_to_ptr.vmem [resolvable:$true] %s177_s13 }
  0x2b   :  { %v54_v8 = vsub.s32 0, %v53_v7  ;;  %v58_v10 = vsub.s32 1, %v53_v7  ;;  %s269_s14 = scalar_lea.vmem %s178_s13, 512  ;;  %p274_p3 = scmp.lt.s32.totalorder %s178_s13, %s178_s13 }
  0x2c   :  { %p270_p2 = scmp.ne.s32.totalorder %s178_s13, %s269_s14  ;;  %p275_p4 = scmp.lt.s32.totalorder %s269_s14, %s269_s14 }
  0x2d   :  { %94 = vmatpush1.bf16.msra.mxu0 %v211_v4  ;;  %v55_v11 = vrot.slane %v50_v9, %v54_v8  ;;  %v59_v12 = vrot.slane %v50_v9, %v58_v10 }
  0x2e   :  { %p276_p5 = por %p275_p4, %p274_p3 }
  0x30   :  { %195 = vmatmul.mubr.msk.bf16.vlgmr.msra.gmra.mrb[0].mxu0 %vm87_vm0, %v212_v5  ;;  %p277_p6 = pnand %p276_p5, %p270_p2 }
 0x103   :  { %v125_v13 = vpop.f32.mrb[0].mxu0 }
 0x104   :  { %v126_v14 = vadd.f32 %v125_v13, %v55_v11  ;;  %v127_v15 = vpop.f32.mrb[1].mxu0 }
 0x105   :  { %v128_v16 = vadd.f32 %v127_v15, %v59_v12  ;;  %v129_v17 = vpop.f32.mrb[2].mxu0 }
 0x106   :  { %v131_v18 = vpop.f32.mrb[3].mxu0  ;;  %v130_v19 = vadd.f32 %v129_v17, %v55_v11 }
 0x107   :  { %v132_v20 = vadd.f32 %v131_v18, %v59_v12  ;;  %v134_v21 = vmax.f32 %v126_v14, %v128_v16 }
 0x109   :  { %135 = vmax.xlane.f32.xlu0 %v134_v21  ;;  %v137_v22 = vmax.f32 %v130_v19, %v132_v20 }
 0x10d   :  { %138 = vmax.xlane.f32.xlu0 %v137_v22 }
 0x196   :  { %v136_v23 = vpop.xlane.xlu0 %135 }
 0x197   :  { %v140_v24 = vsub.f32 %v126_v14, %v136_v23  ;;  %v141_v25 = vsub.f32 %v128_v16, %v136_v23 }
 0x199   :  { %v144_v26 = vmul.f32 1.442695, %v140_v24  ;;  %v146_v27 = vmul.f32 1.442695, %v141_v25 }
 0x19a   :  { %v139_v28 = vpop.xlane.xlu0 %138 }
 0x19b   :  { %213 = vpow2.f32 %v144_v26  ;;  %v142_v29 = vsub.f32 %v130_v19, %v139_v28  ;;  %v143_v30 = vsub.f32 %v132_v20, %v139_v28 }
 0x19c   :  { %215 = vpow2.f32 %v146_v27 }
 0x19d   :  { %v148_v31 = vmul.f32 1.442695, %v142_v29  ;;  %v150_v32 = vmul.f32 1.442695, %v143_v30 }
 0x19f   :  { %217 = vpow2.f32 %v148_v31 }
 0x1a0   :  { %219 = vpow2.f32 %v150_v32 }
 0x1a5   :  { %v214_v33 = vpop.eup %213 }
 0x1a6   :  { %v216_v34 = vpop.eup %215 }
 0x1a7   :  { %v152_v35 = vadd.f32 %v216_v34, %v214_v33 }
 0x1a9   :  { %v218_v36 = vpop.eup %217  ;;  %153 = vadd.xlane.f32.xlu1 %v152_v35 }
 0x1aa   :  { %v220_v37 = vpop.eup %219 }
 0x1ab   :  { %v155_v38 = vadd.f32 %v220_v37, %v218_v36 }
 0x1ad   :  { %156 = vadd.xlane.f32.xlu1 %v155_v38 }
 0x236   :  { %v154_v39 = vpop.xlane.xlu1 %153 }
 0x237   :  { %221 = vlog2.f32 %v154_v39 }
 0x23a   :  { %v157_v40 = vpop.xlane.xlu1 %156 }
 0x23b   :  { %223 = vlog2.f32 %v157_v40 }
 0x241   :  { %v222_v41 = vpop.eup %221 }
 0x242   :  { %v159_v42 = vmul.f32 0.6931472, %v222_v41 }
 0x244   :  { %v162_v43 = vadd.f32 %v159_v42, %v136_v23 }
 0x245   :  { %v224_v44 = vpop.eup %223 }
 0x246   :  { %v164_v45 = vsub.f32 %v126_v14, %v162_v43  ;;  %v165_v46 = vsub.f32 %v128_v16, %v162_v43  ;;  %v161_v47 = vmul.f32 0.6931472, %v224_v44 }
 0x248   :  { %168 = vst [vmem:[#allocation7] sm:$0xff] %v164_v45  ;;  %169 = vst [vmem:[#allocation7 + $0x8] sm:$0xff] %v165_v46  ;;  %v163_v48 = vadd.f32 %v161_v47, %v139_v28 }
 0x24a   :  { %v166_v49 = vsub.f32 %v130_v19, %v163_v48  ;;  %v167_v50 = vsub.f32 %v132_v20, %v163_v48 }
 0x24c   :  { %170 = vst [vmem:[#allocation7 + $0x10] sm:$0xff] %v166_v49  ;;  %171 = vst [vmem:[#allocation7 + $0x18] sm:$0xff] %v167_v50 }
 0x24d   :  { %280 = shalt.err (!%p277_p6)
}
 0x24e   :  { %s281_s17 = scalar_lea.hbm %s369_s3, 512 }
 0x24f   :  { %p282_p7 = scmp.ne.s32.totalorder %s369_s3, %s281_s17  ;;  %p285_p8 = scmp.lt.u32.totalorder %s281_s17, %s369_s3 }
 0x251   :  { %p287_p9 = pnand %p285_p8, %p282_p7 }
 0x253   :  { %290 = shalt.err (!%p287_p9)
}
 0x254   :  { %s305_s22 = smov 256   ;;  %s306_s23 = smov 16  }
 0x255   :  { %183 = dma.vmem_to_hbm [thread:$0]  %s178_s13, 512, %s369_s3, [#allocation4], %s305_s22, %s305_s22, %s306_s23  }
 0x256   :  { %295 = dma.done.wait [#allocation4], 512  }
 0x257   :  { %296 = vsyncadd [#allocation4], 4294966784 }
 0x258   :  { %187 = vsyncpa [#allocation3], 1 }
 0x259   :  { %188 = vsyncpa [#allocation6], 1 }
 0x25a   :  { %189 = vsyncpa [#allocation4], 1 }

</bundles_post_ra>
